<compile_context>
chip_gen: v6e
topology: v6e:2x2x1
jax: 0.10.0
libtpu: 0.0.40
codegen_flags: <defaults>
</compile_context>

<pallas_src>
import functools

import jax
import jax.numpy as jnp
from jax.experimental import pallas as pl
from jax.experimental.pallas import tpu as pltpu

IN_F = 4      # fc1 input features
HIDDEN = 8    # fc1 output / fc2 input features
OUT_F = 2     # fc2 output features

# Packed-parameter slab layout (one (8, 128) f32 vreg):
#   p[:, 0:4]    = w1.T   (8, 4)  column k = w1[k, :]
#   p[:, 4:5]    = b1     (8, 1)
#   p[0:2, 8:16] = w2.T   (2, 8)  column j = w2[j, :]
#   p[0:2,16:17] = b2     (2, 1)


def simplenet_kernel(cond_ref, xt_ref, p_ref, ot_ref, act_ref):
    # cond_ref: SMEM scalar-prefetch, shape (1,) int32; 1 -> relu, 0 -> sigmoid.
    use_relu = cond_ref[0] > 0

    xt = xt_ref[...]                       # (4, TB)  batch on lanes
    p = p_ref[...]                         # (8, 128) packed params
    tb = xt.shape[1]

    w1t = p[:, 0:IN_F]                     # (8, 4)
    b1c = p[:, IN_F:IN_F + 1]              # (8, 1)
    w2t = p[0:OUT_F, 8:8 + HIDDEN]         # (2, 8)
    b2c = p[0:OUT_F, 16:17]                # (2, 1)

    # fc1: h = W1^T @ x^T + b1  -> (8, TB), done as 4 VPU broadcast-FMAs
    # (K=4 is far too small for the MXU to be worth its push/pop latency).
    h = jnp.broadcast_to(b1c, (HIDDEN, tb))
    for k in range(IN_F):
        h = h + w1t[:, k:k + 1] * xt[k:k + 1, :]

    # Data-dependent activation chosen by the precomputed GLOBAL mean of x.
    # Only the live branch executes (scf.if); dead-branch tanh/VALU work is
    # skipped entirely.
    @pl.when(use_relu)
    def _():
        act_ref[...] = jnp.maximum(h, 0.0)

    @pl.when(jnp.logical_not(use_relu))
    def _():
        act_ref[...] = 0.5 * (jnp.tanh(0.5 * h) + 1.0)   # numerically stable sigmoid

    ha = act_ref[...]                      # (8, TB)

    # fc2: out = W2^T @ h + b2  -> (2, TB), 8 VPU broadcast-FMAs.
    out = jnp.broadcast_to(b2c, (OUT_F, tb))
    for j in range(HIDDEN):
        out = out + w2t[:, j:j + 1] * ha[j:j + 1, :]

    ot_ref[...] = out.astype(ot_ref.dtype)                # (2, TB) lane-dense store


def pack_params(w1, b1, w2, b2):
    """Pack (w1 (4,8), b1 (8,), w2 (8,2), b2 (2,)) into one (8, 128) f32 slab."""
    p = jnp.zeros((8, 128), jnp.float32)
    p = p.at[:, 0:IN_F].set(w1.T.astype(jnp.float32))               # (8, 4)
    p = p.at[:, IN_F:IN_F + 1].set(b1.reshape(HIDDEN, 1).astype(jnp.float32))
    p = p.at[0:OUT_F, 8:8 + HIDDEN].set(w2.T.astype(jnp.float32))   # (2, 8)
    p = p.at[0:OUT_F, 16:17].set(b2.reshape(OUT_F, 1).astype(jnp.float32))
    return p


@functools.partial(jax.jit, static_argnames=("tb",))
def simplenet_forward(x, w1, b1, w2, b2, *, tb=32768):
    """x: (B, 4) f32 -> (B, 2) f32, matching SimpleNet.forward semantics.

    Whole forward is jitted so transpose / pad / condition / slice fuse with
    the pallas_call instead of dispatching as separate HBM round trips.
    """
    B = x.shape[0]

    # Lane-dense tile size: multiple of 128, clamped to the (128-padded) batch.
    b128 = pl.cdiv(B, 128) * 128
    tb_eff = min(int(tb), b128)
    b_pad = pl.cdiv(B, tb_eff) * tb_eff

    # Present the problem transposed so the batch dim maps to the 128-lane axis.
    xt = x.T.astype(jnp.float32)                          # (4, B)
    if b_pad != B:
        xt = jnp.pad(xt, ((0, 0), (0, b_pad - B)))        # fused with transpose under jit

    # Global-mean condition computed from the already-materialized x^T:
    # sum > 0  <=>  mean > 0, and the zero padding contributes exactly 0.
    cond = (jnp.sum(xt) > 0.0).astype(jnp.int32).reshape(1)

    params = pack_params(w1, b1, w2, b2)                  # (8, 128)

    grid = (b_pad // tb_eff,)
    out_t = pl.pallas_call(
        simplenet_kernel,
        out_shape=jax.ShapeDtypeStruct((OUT_F, b_pad), jnp.float32),
        grid_spec=pltpu.PrefetchScalarGridSpec(
            num_scalar_prefetch=1,
            grid=grid,
            in_specs=[
                # x^T tile: batch on lanes, double-buffered across grid steps.
                pl.BlockSpec((IN_F, tb_eff), lambda i, cond_ref: (0, i)),
                # packed weights: constant block index -> VMEM-resident.
                pl.BlockSpec((8, 128), lambda i, cond_ref: (0, 0)),
            ],
            out_specs=pl.BlockSpec((OUT_F, tb_eff), lambda i, cond_ref: (0, i)),
            # Activation scratch written by whichever pl.when branch is live.
            scratch_shapes=[pltpu.VMEM((HIDDEN, tb_eff), jnp.float32)],
        ),
        compiler_params=pltpu.CompilerParams(
            # Batch tiles are independent -> lets v7x shard across its 2 TCs.
            dimension_semantics=("parallel",),
        ),
        cost_estimate=pl.CostEstimate(
            flops=b_pad * (2 * IN_F * HIDDEN + 2 * HIDDEN * OUT_F),
            # Only the sigmoid path uses the EUP; charge it as the upper bound.
            transcendentals=b_pad * HIDDEN,
            bytes_accessed=b_pad * (IN_F + OUT_F) * 4 + 8 * 128 * 4,
        ),
    )(cond, xt, params)

    return out_t[:, :B].T                                 # (B, 2)


def reference_forward(x, w1, b1, w2, b2):
    h = x @ w1 + b1
    h = jnp.where(jnp.mean(x) > 0, jax.nn.relu(h), jax.nn.sigmoid(h))
    return h @ w2 + b2


if __name__ == "__main__":
    key = jax.random.PRNGKey(0)
    kx, k1, kb1, k2, kb2 = jax.random.split(key, 5)

    # Parameters (stored (in, out) so forward is x @ W + b, same math as nn.Linear).
    w1 = jax.random.normal(k1, (IN_F, HIDDEN), dtype=jnp.float32) * 0.5
    b1 = jax.random.normal(kb1, (HIDDEN,), dtype=jnp.float32) * 0.1
    w2 = jax.random.normal(k2, (HIDDEN, OUT_F), dtype=jnp.float32) * 0.5
    b2 = jax.random.normal(kb2, (OUT_F,), dtype=jnp.float32) * 0.1

    # Small batch of 256 rows of 4 features (one 256-lane tile).
    x = jax.random.normal(kx, (256, IN_F), dtype=jnp.float32)

    # Positive-mean (relu) branch.
    x_pos = x + 2.0
    out = jax.block_until_ready(simplenet_forward(x_pos, w1, b1, w2, b2))
    ref = reference_forward(x_pos, w1, b1, w2, b2)
    assert out.shape == (256, OUT_F)
    assert jnp.allclose(out, ref, atol=1e-5, rtol=1e-5)

    # Negative-mean (sigmoid) branch.
    x_neg = x - 2.0
    out_neg = jax.block_until_ready(simplenet_forward(x_neg, w1, b1, w2, b2))
    ref_neg = reference_forward(x_neg, w1, b1, w2, b2)
    assert jnp.allclose(out_neg, ref_neg, atol=1e-5, rtol=1e-5)

    # Ragged batch (exercises zero-padding + output slicing).
    x_ragged = x[:100] - 2.0
    out_r = jax.block_until_ready(simplenet_forward(x_ragged, w1, b1, w2, b2))
    ref_r = reference_forward(x_ragged, w1, b1, w2, b2)
    assert out_r.shape == (100, OUT_F)
    assert jnp.allclose(out_r, ref_r, atol=1e-5, rtol=1e-5)

    print("KERNEL_OK")
</pallas_src>

<mosaic_0001>
module attributes {stable_mosaic.version = 11 : i64} {
  func.func @simplenet_kernel(%arg0: i32, %arg1: memref<1xi32, #tpu.memory_space<smem>>, %arg2: memref<4x256xf32, #tpu.memory_space<vmem>>, %arg3: memref<8x128xf32, #tpu.memory_space<vmem>>, %arg4: memref<2x256xf32, #tpu.memory_space<vmem>>, %arg5: memref<8x256xf32, #tpu.memory_space<vmem>>) attributes {dimension_semantics = [#tpu.dimension_semantics<parallel>], iteration_bounds = array<i64: 1>, scalar_prefetch = 1 : i64, scratch_operands = 1 : i64, tpu.core_type = #tpu.core_type<tc>, window_params = [{transform_indices = @transform_0, window_bounds = array<i64: 4, 256>}, {pipeline_mode = #tpu.pipeline_mode<synchronous>, transform_indices = @transform_1, window_bounds = array<i64: 8, 128>}, {transform_indices = @transform_2, window_bounds = array<i64: 2, 256>}]} {
    %c0 = arith.constant 0 : index
    %0 = memref.load %arg1[%c0] : memref<1xi32, #tpu.memory_space<smem>>
    %c0_i32 = arith.constant 0 : i32
    %1 = arith.cmpi sgt, %0, %c0_i32 : i32
    %c0_0 = arith.constant 0 : index
    %c0_1 = arith.constant 0 : index
    %2 = vector.load %arg2[%c0_0, %c0_1] : memref<4x256xf32, #tpu.memory_space<vmem>>, vector<4x256xf32>
    %c0_2 = arith.constant 0 : index
    %c0_3 = arith.constant 0 : index
    %3 = vector.load %arg3[%c0_2, %c0_3] : memref<8x128xf32, #tpu.memory_space<vmem>>, vector<8x128xf32>
    %4 = vector.extract_strided_slice %3 {offsets = [0, 0], sizes = [8, 4], strides = [1, 1]} : vector<8x128xf32> to vector<8x4xf32>
    %5 = vector.extract_strided_slice %3 {offsets = [0, 4], sizes = [8, 1], strides = [1, 1]} : vector<8x128xf32> to vector<8x1xf32>
    %6 = vector.extract_strided_slice %3 {offsets = [0, 8], sizes = [2, 8], strides = [1, 1]} : vector<8x128xf32> to vector<2x8xf32>
    %7 = vector.extract_strided_slice %3 {offsets = [0, 16], sizes = [2, 1], strides = [1, 1]} : vector<8x128xf32> to vector<2x1xf32>
    %8 = vector.shape_cast %5 : vector<8x1xf32> to vector<8x1xf32>
    %9 = vector.broadcast %8 : vector<8x1xf32> to vector<8x256xf32>
    %10 = vector.extract_strided_slice %4 {offsets = [0, 0], sizes = [8, 1], strides = [1, 1]} : vector<8x4xf32> to vector<8x1xf32>
    %11 = vector.extract_strided_slice %2 {offsets = [0, 0], sizes = [1, 256], strides = [1, 1]} : vector<4x256xf32> to vector<1x256xf32>
    %12 = vector.broadcast %10 : vector<8x1xf32> to vector<8x256xf32>
    %13 = vector.broadcast %11 : vector<1x256xf32> to vector<8x256xf32>
    %14 = arith.mulf %12, %13 : vector<8x256xf32>
    %15 = arith.addf %9, %14 : vector<8x256xf32>
    %16 = vector.extract_strided_slice %4 {offsets = [0, 1], sizes = [8, 1], strides = [1, 1]} : vector<8x4xf32> to vector<8x1xf32>
    %17 = vector.extract_strided_slice %2 {offsets = [1, 0], sizes = [1, 256], strides = [1, 1]} : vector<4x256xf32> to vector<1x256xf32>
    %18 = vector.broadcast %16 : vector<8x1xf32> to vector<8x256xf32>
    %19 = vector.broadcast %17 : vector<1x256xf32> to vector<8x256xf32>
    %20 = arith.mulf %18, %19 : vector<8x256xf32>
    %21 = arith.addf %15, %20 : vector<8x256xf32>
    %22 = vector.extract_strided_slice %4 {offsets = [0, 2], sizes = [8, 1], strides = [1, 1]} : vector<8x4xf32> to vector<8x1xf32>
    %23 = vector.extract_strided_slice %2 {offsets = [2, 0], sizes = [1, 256], strides = [1, 1]} : vector<4x256xf32> to vector<1x256xf32>
    %24 = vector.broadcast %22 : vector<8x1xf32> to vector<8x256xf32>
    %25 = vector.broadcast %23 : vector<1x256xf32> to vector<8x256xf32>
    %26 = arith.mulf %24, %25 : vector<8x256xf32>
    %27 = arith.addf %21, %26 : vector<8x256xf32>
    %28 = vector.extract_strided_slice %4 {offsets = [0, 3], sizes = [8, 1], strides = [1, 1]} : vector<8x4xf32> to vector<8x1xf32>
    %29 = vector.extract_strided_slice %2 {offsets = [3, 0], sizes = [1, 256], strides = [1, 1]} : vector<4x256xf32> to vector<1x256xf32>
    %30 = vector.broadcast %28 : vector<8x1xf32> to vector<8x256xf32>
    %31 = vector.broadcast %29 : vector<1x256xf32> to vector<8x256xf32>
    %32 = arith.mulf %30, %31 : vector<8x256xf32>
    %33 = arith.addf %27, %32 : vector<8x256xf32>
    %34 = arith.extui %1 : i1 to i32
    %c0_i32_4 = arith.constant 0 : i32
    %35 = arith.cmpi ne, %34, %c0_i32_4 : i32
    scf.if %35 {
      %cst = arith.constant 0.000000e+00 : f32
      %91 = vector.broadcast %cst : f32 to vector<8x256xf32>
      %92 = arith.maximumf %33, %91 : vector<8x256xf32>
      %c0_10 = arith.constant 0 : index
      %c0_11 = arith.constant 0 : index
      %93 = vector.load %arg5[%c0_10, %c0_11] : memref<8x256xf32, #tpu.memory_space<vmem>>, vector<8x256xf32>
      tpu.vector_store %arg5[%c0_10, %c0_11], %92 {strides = array<i32>} : memref<8x256xf32, #tpu.memory_space<vmem>>, vector<8x256xf32>,
    } else {
    }
    %true = arith.constant true
    %36 = arith.xori %1, %true : i1
    %37 = arith.extui %36 : i1 to i32
    %c0_i32_5 = arith.constant 0 : i32
    %38 = arith.cmpi ne, %37, %c0_i32_5 : i32
    scf.if %38 {
      %cst = arith.constant 5.000000e-01 : f32
      %91 = vector.broadcast %cst : f32 to vector<8x256xf32>
      %92 = arith.mulf %91, %33 : vector<8x256xf32>
      %93 = math.tanh %92 : vector<8x256xf32>
      %cst_10 = arith.constant 1.000000e+00 : f32
      %94 = vector.broadcast %cst_10 : f32 to vector<8x256xf32>
      %95 = arith.addf %93, %94 : vector<8x256xf32>
      %cst_11 = arith.constant 5.000000e-01 : f32
      %96 = vector.broadcast %cst_11 : f32 to vector<8x256xf32>
      %97 = arith.mulf %96, %95 : vector<8x256xf32>
      %c0_12 = arith.constant 0 : index
      %c0_13 = arith.constant 0 : index
      %98 = vector.load %arg5[%c0_12, %c0_13] : memref<8x256xf32, #tpu.memory_space<vmem>>, vector<8x256xf32>
      tpu.vector_store %arg5[%c0_12, %c0_13], %97 {strides = array<i32>} : memref<8x256xf32, #tpu.memory_space<vmem>>, vector<8x256xf32>,
    } else {
    }
    %c0_6 = arith.constant 0 : index
    %c0_7 = arith.constant 0 : index
    %39 = vector.load %arg5[%c0_6, %c0_7] : memref<8x256xf32, #tpu.memory_space<vmem>>, vector<8x256xf32>
    %40 = vector.shape_cast %7 : vector<2x1xf32> to vector<2x1xf32>
    %41 = vector.broadcast %40 : vector<2x1xf32> to vector<2x256xf32>
    %42 = vector.extract_strided_slice %6 {offsets = [0, 0], sizes = [2, 1], strides = [1, 1]} : vector<2x8xf32> to vector<2x1xf32>
    %43 = vector.extract_strided_slice %39 {offsets = [0, 0], sizes = [1, 256], strides = [1, 1]} : vector<8x256xf32> to vector<1x256xf32>
    %44 = vector.broadcast %42 : vector<2x1xf32> to vector<2x256xf32>
    %45 = vector.broadcast %43 : vector<1x256xf32> to vector<2x256xf32>
    %46 = arith.mulf %44, %45 : vector<2x256xf32>
    %47 = arith.addf %41, %46 : vector<2x256xf32>
    %48 = vector.extract_strided_slice %6 {offsets = [0, 1], sizes = [2, 1], strides = [1, 1]} : vector<2x8xf32> to vector<2x1xf32>
    %49 = vector.extract_strided_slice %39 {offsets = [1, 0], sizes = [1, 256], strides = [1, 1]} : vector<8x256xf32> to vector<1x256xf32>
    %50 = vector.broadcast %48 : vector<2x1xf32> to vector<2x256xf32>
    %51 = vector.broadcast %49 : vector<1x256xf32> to vector<2x256xf32>
    %52 = arith.mulf %50, %51 : vector<2x256xf32>
    %53 = arith.addf %47, %52 : vector<2x256xf32>
    %54 = vector.extract_strided_slice %6 {offsets = [0, 2], sizes = [2, 1], strides = [1, 1]} : vector<2x8xf32> to vector<2x1xf32>
    %55 = vector.extract_strided_slice %39 {offsets = [2, 0], sizes = [1, 256], strides = [1, 1]} : vector<8x256xf32> to vector<1x256xf32>
    %56 = vector.broadcast %54 : vector<2x1xf32> to vector<2x256xf32>
    %57 = vector.broadcast %55 : vector<1x256xf32> to vector<2x256xf32>
    %58 = arith.mulf %56, %57 : vector<2x256xf32>
    %59 = arith.addf %53, %58 : vector<2x256xf32>
    %60 = vector.extract_strided_slice %6 {offsets = [0, 3], sizes = [2, 1], strides = [1, 1]} : vector<2x8xf32> to vector<2x1xf32>
    %61 = vector.extract_strided_slice %39 {offsets = [3, 0], sizes = [1, 256], strides = [1, 1]} : vector<8x256xf32> to vector<1x256xf32>
    %62 = vector.broadcast %60 : vector<2x1xf32> to vector<2x256xf32>
    %63 = vector.broadcast %61 : vector<1x256xf32> to vector<2x256xf32>
    %64 = arith.mulf %62, %63 : vector<2x256xf32>
    %65 = arith.addf %59, %64 : vector<2x256xf32>
    %66 = vector.extract_strided_slice %6 {offsets = [0, 4], sizes = [2, 1], strides = [1, 1]} : vector<2x8xf32> to vector<2x1xf32>
    %67 = vector.extract_strided_slice %39 {offsets = [4, 0], sizes = [1, 256], strides = [1, 1]} : vector<8x256xf32> to vector<1x256xf32>
    %68 = vector.broadcast %66 : vector<2x1xf32> to vector<2x256xf32>
    %69 = vector.broadcast %67 : vector<1x256xf32> to vector<2x256xf32>
    %70 = arith.mulf %68, %69 : vector<2x256xf32>
    %71 = arith.addf %65, %70 : vector<2x256xf32>
    %72 = vector.extract_strided_slice %6 {offsets = [0, 5], sizes = [2, 1], strides = [1, 1]} : vector<2x8xf32> to vector<2x1xf32>
    %73 = vector.extract_strided_slice %39 {offsets = [5, 0], sizes = [1, 256], strides = [1, 1]} : vector<8x256xf32> to vector<1x256xf32>
    %74 = vector.broadcast %72 : vector<2x1xf32> to vector<2x256xf32>
    %75 = vector.broadcast %73 : vector<1x256xf32> to vector<2x256xf32>
    %76 = arith.mulf %74, %75 : vector<2x256xf32>
    %77 = arith.addf %71, %76 : vector<2x256xf32>
    %78 = vector.extract_strided_slice %6 {offsets = [0, 6], sizes = [2, 1], strides = [1, 1]} : vector<2x8xf32> to vector<2x1xf32>
    %79 = vector.extract_strided_slice %39 {offsets = [6, 0], sizes = [1, 256], strides = [1, 1]} : vector<8x256xf32> to vector<1x256xf32>
    %80 = vector.broadcast %78 : vector<2x1xf32> to vector<2x256xf32>
    %81 = vector.broadcast %79 : vector<1x256xf32> to vector<2x256xf32>
    %82 = arith.mulf %80, %81 : vector<2x256xf32>
    %83 = arith.addf %77, %82 : vector<2x256xf32>
    %84 = vector.extract_strided_slice %6 {offsets = [0, 7], sizes = [2, 1], strides = [1, 1]} : vector<2x8xf32> to vector<2x1xf32>
    %85 = vector.extract_strided_slice %39 {offsets = [7, 0], sizes = [1, 256], strides = [1, 1]} : vector<8x256xf32> to vector<1x256xf32>
    %86 = vector.broadcast %84 : vector<2x1xf32> to vector<2x256xf32>
    %87 = vector.broadcast %85 : vector<1x256xf32> to vector<2x256xf32>
    %88 = arith.mulf %86, %87 : vector<2x256xf32>
    %89 = arith.addf %83, %88 : vector<2x256xf32>
    %c0_8 = arith.constant 0 : index
    %c0_9 = arith.constant 0 : index
    %90 = vector.load %arg4[%c0_8, %c0_9] : memref<2x256xf32, #tpu.memory_space<vmem>>, vector<2x256xf32>
    tpu.vector_store %arg4[%c0_8, %c0_9], %89 {strides = array<i32>} : memref<2x256xf32, #tpu.memory_space<vmem>>, vector<2x256xf32>,
    return
  }
  func.func @transform_0(%arg0: i32, %arg1: memref<1xi32, #tpu.memory_space<smem>>) -> (i32, i32) {
    %c0_i32 = arith.constant 0 : i32
    %c0_i32_0 = arith.constant 0 : i32
    return %c0_i32, %arg0 : i32, i32
  }
  func.func @transform_1(%arg0: i32, %arg1: memref<1xi32, #tpu.memory_space<smem>>) -> (i32, i32) {
    %c0_i32 = arith.constant 0 : i32
    %c0_i32_0 = arith.constant 0 : i32
    %c0_i32_1 = arith.constant 0 : i32
    return %c0_i32, %c0_i32_0 : i32, i32
  }
  func.func @transform_2(%arg0: i32, %arg1: memref<1xi32, #tpu.memory_space<smem>>) -> (i32, i32) {
    %c0_i32 = arith.constant 0 : i32
    %c0_i32_0 = arith.constant 0 : i32
    return %c0_i32, %arg0 : i32, i32
  }
}

</mosaic_0001>

<bundles_post_ra>
// kernel: simplenet_forward.1
= control target key start
LH: loop header
LB: loop body
LE: loop exit
PB: predicated region body
PF: predicated region fallthrough
CT: control target
= control target key end

     0   :  { %v368_v1 = vmov 1   ;;  %v369_v2 = vmov 0   ;;  %s482_s0 = inlined_call_operand.<no memory space> [shape: s32[1], index: 0, kind: input, shape index: {}]   ;;  %s483_s1 = inlined_call_operand.vmem [shape: f32[4,256], index: 1, kind: input, shape index: {}]   ;;  %s484_s2 = inlined_call_operand.vmem [shape: f32[8,128], index: 2, kind: input, shape index: {}]   ;;  %s485_s3 = inlined_call_operand.hbm [shape: f32[2,256], index: 3, kind: output, shape index: {}]  }
   0x1   :  { %v406_v0 = vld [vmem:[%s484_s2] sm:$0xff]  ;;  %329 = vset.pattern.permute.xlu1 %v368_v1  ;;  %327 = vset.pattern.permute.xlu0 %v369_v2 }
   0x2   :  { %9 = vsyncpa [#allocation6], 0  ;;  %51 = vperm.xlu1 %329, %v406_v0   ;;  %24 = vperm.xlu0 %327, %v406_v0   ;;  %v370_v3 = vmov 2   ;;  %v371_v4 = vmov 4   ;;  %v372_v5 = vmov 3   ;;  %v28_v6 = vlaneseq  ;;  %v16_v10 = vld [vmem:[%s483_s1] sm:$0xff] }
   0x3   :  { %p309_p0 = scmp.le.s32.totalorder %s482_s0, 0 }
   0x4   :  { %v29_v7 = vshrl.u32 %v28_v6, 7 }
   0x6   :  { %330 = vset.pattern.permute.xlu1 %v370_v3  ;;  %328 = vset.pattern.permute.xlu0 %v371_v4  ;;  %v413_v8 = vsub.s32 0, %v29_v7  ;;  %v415_v9 = vsub.s32 4, %v29_v7  ;;  %v420_v11 = vsub.s32 1, %v29_v7  ;;  %v422_v12 = vsub.s32 5, %v29_v7 }
   0x7   :  { %77 = vperm.xlu1 %330, %v406_v0   ;;  %20 = vperm.xlu0 %328, %v406_v0   ;;  %v426_v15 = vsub.s32 2, %v29_v7  ;;  %v428_v16 = vsub.s32 6, %v29_v7  ;;  %v432_v19 = vsub.s32 3, %v29_v7  ;;  %v434_v20 = vsub.s32 7, %v29_v7 }
   0x8   :  { %v31_v13 = vrot.slane %v16_v10, %v413_v8  ;;  %v35_v14 = vrot.slane %v16_v10, %v415_v9  ;;  %v57_v17 = vrot.slane %v16_v10, %v420_v11  ;;  %v61_v18 = vrot.slane %v16_v10, %v422_v12 }
   0x9   :  { %v83_v25 = vrot.slane %v16_v10, %v426_v15  ;;  %v87_v26 = vrot.slane %v16_v10, %v428_v16  ;;  %v109_v29 = vrot.slane %v16_v10, %v432_v19  ;;  %v113_v30 = vrot.slane %v16_v10, %v434_v20 }
   0xa   :  { %v41_v23 = vrot.slane %v31_v13, %v413_v8  ;;  %v45_v24 = vrot.slane %v35_v14, %v413_v8  ;;  %v67_v27 = vrot.slane %v57_v17, %v420_v11  ;;  %v71_v28 = vrot.slane %v61_v18, %v420_v11 }
   0xb   :  { %331 = vset.pattern.permute.xlu1 %v372_v5  ;;  %332 = vset.pattern.permute.xlu0 %v372_v5  ;;  %v93_v33 = vrot.slane %v83_v25, %v426_v15  ;;  %v97_v34 = vrot.slane %v87_v26, %v426_v15  ;;  %v119_v41 = vrot.slane %v109_v29, %v432_v19 }
   0xc   :  { %103 = vperm.xlu1 %331, %v406_v0   ;;  %v123_v42 = vrot.slane %v113_v30, %v432_v19 }
  0x7d   :  { %v52_v21 = vpop.permute.xlu1 %51  ;;  %v25_v22 = vpop.permute.xlu0 %24 }
  0x7e   :  { %v46_v31 = vmul.f32 %v41_v23, %v25_v22  ;;  %v47_v32 = vmul.f32 %v45_v24, %v25_v22  ;;  %v72_v37 = vmul.f32 %v67_v27, %v52_v21  ;;  %v73_v38 = vmul.f32 %v71_v28, %v52_v21 }
  0x82   :  { %v78_v35 = vpop.permute.xlu1 %77  ;;  %v21_v36 = vpop.permute.xlu0 %20 }
  0x83   :  { %v48_v39 = vadd.f32 %v46_v31, %v21_v36  ;;  %v49_v40 = vadd.f32 %v47_v32, %v21_v36  ;;  %v98_v43 = vmul.f32 %v93_v33, %v78_v35  ;;  %v99_v44 = vmul.f32 %v97_v34, %v78_v35 }
  0x85   :  { %v74_v45 = vadd.f32 %v72_v37, %v48_v39  ;;  %v75_v46 = vadd.f32 %v73_v38, %v49_v40 }
  0x86   :  { %130 = sbr.rel (%p309_p0) target bundleno = 143 (0x8f), region = 13 }
  0x87   :  { %v104_v47 = vpop.permute.xlu1 %103  ;;  %v100_v48 = vadd.f32 %v98_v43, %v74_v45  ;;  %v101_v49 = vadd.f32 %v99_v44, %v75_v46 }
  0x88   :  { %v124_v50 = vmul.f32 %v119_v41, %v104_v47  ;;  %v125_v51 = vmul.f32 %v123_v42, %v104_v47 }
  0x8a   :  { %v126_v52 = vadd.f32 %v124_v50, %v100_v48  ;;  %v127_v53 = vadd.f32 %v125_v51, %v101_v49 }
  0x8c   :  { %v131_v54 = vmax.f32 %v126_v52, 0.0  ;;  %v132_v55 = vmax.f32 %v127_v53, 0.0 }
  0x8e   :  { %133 = vst [vmem:[#allocation2] sm:$0xff] %v131_v54  ;;  %134 = vst [vmem:[#allocation2 + $0x8] sm:$0xff] %v132_v55 }
  0x8f PF:  { %p310_p1 = scmp.gt.s32.totalorder %s482_s0, 0 }
  0x91   :  { %138 = sbr.rel (%p310_p1) target bundleno = 172 (0xac), region = 17 }
  0x96   :  { %v139_v56 = vmul.f32 0.5, %v126_v52  ;;  %v140_v57 = vmul.f32 0.5, %v127_v53 }
  0x98   :  { %333 = vtanh.f32 %v139_v56 }
  0x99   :  { %335 = vtanh.f32 %v140_v57 }
  0xa5   :  { %v334_v58 = vpop.eup %333 }
  0xa6   :  { %v336_v59 = vpop.eup %335  ;;  %v143_v60 = vadd.f32 1.0, %v334_v58 }
  0xa7   :  { %v144_v61 = vadd.f32 1.0, %v336_v59 }
  0xa8   :  { %v145_v62 = vmul.f32 0.5, %v143_v60 }
  0xa9   :  { %v146_v63 = vmul.f32 0.5, %v144_v61 }
  0xaa   :  { %147 = vst [vmem:[#allocation2] sm:$0xff] %v145_v62 }
  0xab   :  { %148 = vst [vmem:[#allocation2 + $0x8] sm:$0xff] %v146_v63 }
  0xac PF:  { %v373_v1 = vmov 9   ;;  %v374_v2 = vmov 8   ;;  %v375_v3 = vmov 10   ;;  %v376_v4 = vmov 16   ;;  %s382_s0 = smov [#allocation5]  }
  0xad   :  { %339 = vset.pattern.permute.xlu1 %v373_v1  ;;  %337 = vset.pattern.permute.xlu0 %v374_v2  ;;  %v377_v5 = vmov 11   ;;  %v378_v6 = vmov 12   ;;  %v379_v7 = vmov 13   ;;  %v380_v10 = vmov 15   ;;  %s301_s18 = sshll.u32 %s382_s0, 4  ;;  %s302_s18 = int_to_ptr.vmem [resolvable:$true] %s301_s18 }
  0xae   :  { %172 = vperm.xlu1 %339, %v406_v0   ;;  %156 = vperm.xlu0 %337, %v406_v0   ;;  %v381_v13 = vmov 14   ;;  %s346_s19 = scalar_lea.vmem %s302_s18, 64  ;;  %p351_p3 = scmp.lt.s32.totalorder %s302_s18, %s302_s18 }
  0xaf   :  { %p347_p2 = scmp.ne.s32.totalorder %s302_s18, %s346_s19  ;;  %p352_p4 = scmp.lt.s32.totalorder %s346_s19, %s346_s19 }
  0xb1   :  { %v149_v14 = vld [vmem:[#allocation2] sm:$0xff]  ;;  %p353_p5 = por %p352_p4, %p351_p3 }
  0xb2   :  { %340 = vset.pattern.permute.xlu1 %v375_v3  ;;  %338 = vset.pattern.permute.xlu0 %v376_v4  ;;  %v150_v17 = vld [vmem:[#allocation2 + $0x8] sm:$0xff]  ;;  %v162_v18 = vrot.slane %v149_v14, %v413_v8  ;;  %v178_v24 = vrot.slane %v149_v14, %v420_v11  ;;  %v194_v28 = vrot.slane %v149_v14, %v426_v15 }
  0xb3   :  { %188 = vperm.xlu1 %340, %v406_v0   ;;  %152 = vperm.xlu0 %338, %v406_v0   ;;  %v166_v21 = vrot.slane %v150_v17, %v413_v8  ;;  %v182_v25 = vrot.slane %v150_v17, %v420_v11  ;;  %v198_v29 = vrot.slane %v150_v17, %v426_v15  ;;  %p354_p6 = pnand %p353_p5, %p347_p2 }
  0xb4   :  { %v210_v8 = vrot.slane %v149_v14, %v432_v19  ;;  %v214_v35 = vrot.slane %v150_v17, %v432_v19  ;;  %v226_v39 = vrot.slane %v149_v14, %v415_v9  ;;  %v230_v40 = vrot.slane %v150_v17, %v415_v9 }
  0xb5   :  { %v242_v46 = vrot.slane %v149_v14, %v422_v12  ;;  %v246_v47 = vrot.slane %v150_v17, %v422_v12  ;;  %v258_v52 = vrot.slane %v149_v14, %v428_v16  ;;  %v262_v53 = vrot.slane %v150_v17, %v428_v16 }
  0xb6   :  { %v274_v9 = vrot.slane %v149_v14, %v434_v20  ;;  %v278_v54 = vrot.slane %v150_v17, %v434_v20 }
  0xb7   :  { %341 = vset.pattern.permute.xlu1 %v377_v5  ;;  %342 = vset.pattern.permute.xlu0 %v378_v6 }
  0xb8   :  { %204 = vperm.xlu1 %341, %v406_v0   ;;  %220 = vperm.xlu0 %342, %v406_v0  }
  0xbc   :  { %343 = vset.pattern.permute.xlu1 %v379_v7  ;;  %345 = vset.pattern.permute.xlu0 %v380_v10 }
  0xbd   :  { %236 = vperm.xlu1 %343, %v406_v0   ;;  %268 = vperm.xlu0 %345, %v406_v0  }
  0xc1   :  { %344 = vset.pattern.permute.xlu1 %v381_v13 }
  0xc2   :  { %252 = vperm.xlu1 %344, %v406_v0  }
 0x129   :  { %v173_v22 = vpop.permute.xlu1 %172  ;;  %v157_v23 = vpop.permute.xlu0 %156 }
 0x12a   :  { %v167_v26 = vmul.f32 %v162_v18, %v157_v23  ;;  %v168_v27 = vmul.f32 %v166_v21, %v157_v23  ;;  %v183_v31 = vmul.f32 %v178_v24, %v173_v22  ;;  %v184_v32 = vmul.f32 %v182_v25, %v173_v22 }
 0x12e   :  { %v189_v30 = vpop.permute.xlu1 %188  ;;  %v153_v0 = vpop.permute.xlu0 %152 }
 0x12f   :  { %v169_v33 = vadd.f32 %v167_v26, %v153_v0  ;;  %v170_v34 = vadd.f32 %v168_v27, %v153_v0  ;;  %v199_v36 = vmul.f32 %v194_v28, %v189_v30  ;;  %v200_v37 = vmul.f32 %v198_v29, %v189_v30 }
 0x131   :  { %v185_v38 = vadd.f32 %v183_v31, %v169_v33  ;;  %v186_v11 = vadd.f32 %v184_v32, %v170_v34 }
 0x133   :  { %v205_v41 = vpop.permute.xlu1 %204  ;;  %v201_v15 = vadd.f32 %v199_v36, %v185_v38  ;;  %v202_v42 = vadd.f32 %v200_v37, %v186_v11  ;;  %v221_v43 = vpop.permute.xlu0 %220 }
 0x134   :  { %v215_v44 = vmul.f32 %v210_v8, %v205_v41  ;;  %v216_v45 = vmul.f32 %v214_v35, %v205_v41  ;;  %v231_v49 = vmul.f32 %v226_v39, %v221_v43  ;;  %v232_v50 = vmul.f32 %v230_v40, %v221_v43 }
 0x136   :  { %v217_v48 = vadd.f32 %v215_v44, %v201_v15  ;;  %v218_v19 = vadd.f32 %v216_v45, %v202_v42 }
 0x138   :  { %v237_v51 = vpop.permute.xlu1 %236  ;;  %v233_v55 = vadd.f32 %v231_v49, %v217_v48  ;;  %v234_v56 = vadd.f32 %v232_v50, %v218_v19  ;;  %v269_v59 = vpop.permute.xlu0 %268 }
 0x139   :  { %v247_v57 = vmul.f32 %v242_v46, %v237_v51  ;;  %v248_v58 = vmul.f32 %v246_v47, %v237_v51  ;;  %v279_v12 = vmul.f32 %v274_v9, %v269_v59  ;;  %v280_v61 = vmul.f32 %v278_v54, %v269_v59 }
 0x13b   :  { %v249_v62 = vadd.f32 %v247_v57, %v233_v55  ;;  %v250_v63 = vadd.f32 %v248_v58, %v234_v56 }
 0x13d   :  { %v253_v60 = vpop.permute.xlu1 %252 }
 0x13e   :  { %v263_v1 = vmul.f32 %v258_v52, %v253_v60  ;;  %v264_v2 = vmul.f32 %v262_v53, %v253_v60 }
 0x140   :  { %v265_v3 = vadd.f32 %v263_v1, %v249_v62  ;;  %v266_v4 = vadd.f32 %v264_v2, %v250_v63 }
 0x142   :  { %v281_v16 = vadd.f32 %v279_v12, %v265_v3  ;;  %v282_v5 = vadd.f32 %v280_v61, %v266_v4 }
 0x144   :  { %v285_v6 = vcombine.low %v281_v16, %v282_v5 }
 0x146   :  { %311 = vst.sshfl [vmem:[#allocation5] sm:$0x33 pattern:$0x76325410] %v285_v6 }
 0x147   :  { %357 = shalt.err (!%p354_p6)
}
 0x148   :  { %304 = dma.vmem_to_hbm [thread:$0]  %s302_s18, 64, %s485_s3, [#allocation6]  }
 0x149   :  { %366 = dma.done.wait [#allocation6], 64  }
 0x14a   :  { %367 = vsyncadd [#allocation6], 4294967232 }
 0x14b   :  { %308 = vsyncpa [#allocation6], 1 }

</bundles_post_ra>
